<compile_context>
chip_gen: v7x
topology: tpu7x:2x2x1
jax: 0.10.0
libtpu: 0.0.40
codegen_flags: <defaults>
</compile_context>

<pallas_src>
from functools import partial

import numpy as np
import jax
import jax.numpy as jnp
from jax.experimental import pallas as pl
from jax.experimental.pallas import tpu as pltpu

MAX_TILE = 8192          # lane-tile cap: 2 * (36 + 3) * 8192 * 4 B ≈ 2.5 MB << VMEM
_MIN_SPLIT_TILE = 1024   # when splitting into >=2 grid steps, keep tiles >= this


# ----------------------------------------------------------------------------- kernel
def _simplex_kernel(v_ref, z_ref):
    """Fused geometry for 1-, 2-, 3-simplices, component-major input layout.

    v_ref: (36, T) f32.  Row = comp*12 + col, comp in {x, y, z}.
        cols 0..5  (minuends)    : [tri_b, tet_b, tri_c, tet_c, edge_b, tet_d]
        cols 6..11 (base points) : [tri_a, tet_a, tri_a, tet_a, edge_a, tet_a]
    z_ref: (3, T) f32.  Rows: z1 (edge length), z2 (triangle area), z3 (tet volume).
    """
    # Grouped (6, T) differences: one subtraction per component covers all six edge
    # vectors needed by the three simplex orders (fills sublanes instead of 18
    # single-row subtractions).
    dx = v_ref[0:6, :] - v_ref[6:12, :]
    dy = v_ref[12:18, :] - v_ref[18:24, :]
    dz = v_ref[24:30, :] - v_ref[30:36, :]
    # d* rows: [tri_ab, tet_ab, tri_ac, tet_ac, edge_ab, tet_ad]

    # ---- 1-simplices: z1 = ||edge_ab|| (row 4).
    sq = dx * dx + dy * dy + dz * dz
    z_ref[0:1, :] = jnp.sqrt(sq[4:5, :])

    # ---- cross products for triangle (row 0) and tetrahedron (row 1) as (2, T) blocks.
    ux, uy, uz = dx[0:2, :], dy[0:2, :], dz[0:2, :]      # [tri_ab, tet_ab]
    wx, wy, wz = dx[2:4, :], dy[2:4, :], dz[2:4, :]      # [tri_ac, tet_ac]
    cx = uy * wz - uz * wy
    cy = uz * wx - ux * wz
    cz = ux * wy - uy * wx

    # ---- 2-simplices: z2 = ||cross(tri_ab, tri_ac)|| / 2.
    cn = (cx[0:1, :] * cx[0:1, :] + cy[0:1, :] * cy[0:1, :] + cz[0:1, :] * cz[0:1, :])
    z_ref[1:2, :] = jnp.sqrt(cn) * 0.5

    # ---- 3-simplices: z3 = |cross(tet_ab, tet_ac) . tet_ad| / 6.
    tp = (cx[1:2, :] * dx[5:6, :] + cy[1:2, :] * dy[5:6, :] + cz[1:2, :] * dz[5:6, :])
    z_ref[2:3, :] = jnp.abs(tp) * (1.0 / 6.0)


# --------------------------------------------------------------------- device wrapper
@partial(jax.jit, static_argnames=("e1", "e2", "e3", "tile"))
def _device_z(pos, idx_t, e1, e2, e3, tile):
    """Gather + kernel + per-order slices fused into a single XLA dispatch.

    pos:   (N, 3) f32
    idx_t: (12, ep) int32, rows = kernel columns (minuends then base points)
    """
    ep = idx_t.shape[1]
    # Component-major gather -> (3, 12, ep); the reshape to (36, ep) is free
    # (row-major), so there is no post-gather transpose/relayout.
    slab = pos.T[:, idx_t].reshape(36, ep)

    z = pl.pallas_call(
        _simplex_kernel,
        grid=(ep // tile,),
        in_specs=[pl.BlockSpec((36, tile), lambda i: (0, i))],
        out_specs=pl.BlockSpec((3, tile), lambda i: (0, i)),
        out_shape=jax.ShapeDtypeStruct((3, ep), jnp.float32),
        compiler_params=pltpu.CompilerParams(dimension_semantics=("parallel",)),
    )(slab)
    return z[0, :e1], z[1, :e2], z[2, :e3]


def _round_up(x, m):
    return ((x + m - 1) // m) * m


def _pick_tile(ep):
    """Largest 128-multiple divisor of ep that is <= MAX_TILE.  For large ep, prefer
    a tile giving >= 2 grid steps so both v7x TensorCores get work (no effect on
    v5e/v6e where a single large tile is equally fine)."""
    assert ep % 128 == 0 and MAX_TILE % 128 == 0
    divs = [d for d in range(128, min(ep, MAX_TILE) + 1, 128) if ep % d == 0]
    tile = divs[-1]
    if tile == ep and ep >= 2 * _MIN_SPLIT_TILE:
        half = [d for d in divs if d <= ep // 2 and d >= _MIN_SPLIT_TILE]
        if half:
            tile = half[-1]
    return tile


def _pad_rows(idx, ep, ncols):
    """Pad an (E, k) index array to (ep, k) by repeating a valid row (row 0), so
    padded lanes compute real, finite geometry that is simply sliced off.  Empty
    orders are padded with index 0 (valid as long as pos is non-empty)."""
    idx = np.asarray(idx)
    if idx.shape[0] == 0:
        return np.zeros((ep, ncols), dtype=np.int32)
    if idx.shape[0] == ep:
        return idx.astype(np.int32)
    pad = np.broadcast_to(idx[0:1], (ep - idx.shape[0], idx.shape[1]))
    return np.concatenate([idx, pad], axis=0).astype(np.int32)


def compute_z_pallas(pos, s1, s2, s3):
    """Run the fused simplex-geometry kernel. Returns (z1, z2, z3) jnp arrays."""
    pos = jnp.asarray(pos, jnp.float32)
    assert pos.shape[0] > 0 and pos.shape[1] == 3
    e1, e2, e3 = int(np.shape(s1)[0]), int(np.shape(s2)[0]), int(np.shape(s3)[0])
    emax = max(e1, e2, e3)
    if emax == 0:
        empty = jnp.zeros((0,), jnp.float32)
        return empty, empty, empty

    ep = _round_up(emax, 128)
    tile = _pick_tile(ep)

    s1p = _pad_rows(s1, ep, 2)
    s2p = _pad_rows(s2, ep, 3)
    s3p = _pad_rows(s3, ep, 4)

    # Column order matches the kernel's row layout (see _simplex_kernel docstring).
    minu = np.stack([s2p[:, 1], s3p[:, 1], s2p[:, 2], s3p[:, 2], s1p[:, 1], s3p[:, 3]],
                    axis=0)
    base = np.stack([s2p[:, 0], s3p[:, 0], s2p[:, 0], s3p[:, 0], s1p[:, 0], s3p[:, 0]],
                    axis=0)
    idx_t = jnp.asarray(np.concatenate([minu, base], axis=0), jnp.int32)   # (12, ep)

    return _device_z(pos, idx_t, e1, e2, e3, tile)


# ------------------------------------------------------------ host-side combinatorics
def extrace_ls_from_hs(t):
    """Faithful port of the reference (edge-index variant); dict lookup instead of
    O(n^2) list.index but identical insertion order / indices."""
    envelope = []
    seen = {}
    ind_list = []
    for tet in t:
        ind = []
        for i in range(tet.shape[0]):
            res = np.delete(tet, i).tolist()
            res.sort()
            key = tuple(res)
            if key in seen:
                ind.append(seen[key])
            else:
                seen[key] = len(envelope)
                ind.append(len(envelope))
                envelope.append(res)
        ind_list.append(ind)
    edge_index = np.asarray(ind_list).T
    return np.array(envelope), edge_index


def build_simplex_forward(pos, s3):
    """BuildSimplex(order=3).forward with require_edge_index=True semantics.

    Only z1/z2/z3 (and the adjacency index tensors) appear in the reference's
    returned structures; the pos*/ori* locals in the reference are never used, so
    they are not computed here.
    """
    # Combinatorics (host, no Pallas equivalent).
    s2, am2 = extrace_ls_from_hs(s3)
    s1, am1 = extrace_ls_from_hs(s2)
    am0 = s1.T  # (2, num_edges)

    z1, z2, z3 = compute_z_pallas(pos, s1, s2, s3)

    data = {"pos": jnp.asarray(pos, jnp.float32), "z1": z1, "z2": z2, "z3": z3}
    # Reference stores adjacency/index tensors as int64 (index data, no compute).
    edg_ind = {"am0": am0.astype(np.int64),
               "am1": am1.astype(np.int64),
               "am2": am2.astype(np.int64)}
    return {"data": data, "edg_ind": edg_ind}


# ----------------------------------------------------------------------------- main
if __name__ == "__main__":
    key = jax.random.PRNGKey(0)
    N = 8                                   # number of points, order = 3 (xyz)
    pos = jax.random.normal(key, (N, 3), dtype=jnp.float32)

    # TODO(synk): scipy.spatial.Delaunay has no Pallas/JAX equivalent; use a
    # deterministic synthetic tetrahedralization (sliding-window tets) instead.
    s3 = np.array([[i, i + 1, i + 2, i + 3] for i in range(N - 3)], dtype=np.int64)

    ret = build_simplex_forward(pos, s3)
    jax.block_until_ready(ret["data"])

    # Numpy reference check of the kernel-computed quantities.
    posn = np.asarray(pos)
    s2, _ = extrace_ls_from_hs(s3)
    s1, _ = extrace_ls_from_hs(s2)
    ab1 = posn[s1[:, 1]] - posn[s1[:, 0]]
    z1_ref = np.linalg.norm(ab1, 2, axis=-1)
    ab2 = posn[s2[:, 1]] - posn[s2[:, 0]]
    ac2 = posn[s2[:, 2]] - posn[s2[:, 0]]
    z2_ref = np.linalg.norm(np.cross(ab2, ac2), 2, axis=-1) / 2.0
    ab3 = posn[s3[:, 1]] - posn[s3[:, 0]]
    ac3 = posn[s3[:, 2]] - posn[s3[:, 0]]
    ad3 = posn[s3[:, 3]] - posn[s3[:, 0]]
    z3_ref = np.abs(np.einsum("ij,ij->i", np.cross(ab3, ac3), ad3)) / 6.0

    assert np.allclose(np.asarray(ret["data"]["z1"]), z1_ref, rtol=1e-5, atol=1e-5)
    assert np.allclose(np.asarray(ret["data"]["z2"]), z2_ref, rtol=1e-5, atol=1e-5)
    assert np.allclose(np.asarray(ret["data"]["z3"]), z3_ref, rtol=1e-5, atol=1e-5)

    print("KERNEL_OK")
</pallas_src>

<mosaic_0001>
module attributes {stable_mosaic.version = 11 : i64} {
  func.func @_simplex_kernel(%arg0: i32, %arg1: memref<36x128xf32, #tpu.memory_space<vmem>>, %arg2: memref<3x128xf32, #tpu.memory_space<vmem>>) attributes {dimension_semantics = [#tpu.dimension_semantics<parallel>], iteration_bounds = array<i64: 1>, scalar_prefetch = 0 : i64, scratch_operands = 0 : i64, tpu.core_type = #tpu.core_type<tc>, window_params = [{transform_indices = @transform_0, window_bounds = array<i64: 36, 128>}, {transform_indices = @transform_1, window_bounds = array<i64: 3, 128>}]} {
    %c0 = arith.constant 0 : index
    %c0_0 = arith.constant 0 : index
    %0 = vector.load %arg1[%c0, %c0_0] : memref<36x128xf32, #tpu.memory_space<vmem>>, vector<6x128xf32>
    %c6 = arith.constant 6 : index
    %c0_1 = arith.constant 0 : index
    %1 = vector.load %arg1[%c6, %c0_1] : memref<36x128xf32, #tpu.memory_space<vmem>>, vector<6x128xf32>
    %2 = arith.subf %0, %1 : vector<6x128xf32>
    %c12 = arith.constant 12 : index
    %c0_2 = arith.constant 0 : index
    %3 = vector.load %arg1[%c12, %c0_2] : memref<36x128xf32, #tpu.memory_space<vmem>>, vector<6x128xf32>
    %c18 = arith.constant 18 : index
    %c0_3 = arith.constant 0 : index
    %4 = vector.load %arg1[%c18, %c0_3] : memref<36x128xf32, #tpu.memory_space<vmem>>, vector<6x128xf32>
    %5 = arith.subf %3, %4 : vector<6x128xf32>
    %c24 = arith.constant 24 : index
    %c0_4 = arith.constant 0 : index
    %6 = vector.load %arg1[%c24, %c0_4] : memref<36x128xf32, #tpu.memory_space<vmem>>, vector<6x128xf32>
    %c30 = arith.constant 30 : index
    %c0_5 = arith.constant 0 : index
    %7 = vector.load %arg1[%c30, %c0_5] : memref<36x128xf32, #tpu.memory_space<vmem>>, vector<6x128xf32>
    %8 = arith.subf %6, %7 : vector<6x128xf32>
    %9 = arith.mulf %2, %2 : vector<6x128xf32>
    %10 = arith.mulf %5, %5 : vector<6x128xf32>
    %11 = arith.addf %9, %10 : vector<6x128xf32>
    %12 = arith.mulf %8, %8 : vector<6x128xf32>
    %13 = arith.addf %11, %12 : vector<6x128xf32>
    %14 = vector.extract_strided_slice %13 {offsets = [4, 0], sizes = [1, 128], strides = [1, 1]} : vector<6x128xf32> to vector<1x128xf32>
    %15 = math.sqrt %14 : vector<1x128xf32>
    %c0_6 = arith.constant 0 : index
    %c0_7 = arith.constant 0 : index
    %16 = vector.load %arg2[%c0_6, %c0_7] : memref<3x128xf32, #tpu.memory_space<vmem>>, vector<1x128xf32>
    tpu.vector_store %arg2[%c0_6, %c0_7], %15 {strides = array<i32>} : memref<3x128xf32, #tpu.memory_space<vmem>>, vector<1x128xf32>,
    %17 = vector.extract_strided_slice %2 {offsets = [0, 0], sizes = [2, 128], strides = [1, 1]} : vector<6x128xf32> to vector<2x128xf32>
    %18 = vector.extract_strided_slice %5 {offsets = [0, 0], sizes = [2, 128], strides = [1, 1]} : vector<6x128xf32> to vector<2x128xf32>
    %19 = vector.extract_strided_slice %8 {offsets = [0, 0], sizes = [2, 128], strides = [1, 1]} : vector<6x128xf32> to vector<2x128xf32>
    %20 = vector.extract_strided_slice %2 {offsets = [2, 0], sizes = [2, 128], strides = [1, 1]} : vector<6x128xf32> to vector<2x128xf32>
    %21 = vector.extract_strided_slice %5 {offsets = [2, 0], sizes = [2, 128], strides = [1, 1]} : vector<6x128xf32> to vector<2x128xf32>
    %22 = vector.extract_strided_slice %8 {offsets = [2, 0], sizes = [2, 128], strides = [1, 1]} : vector<6x128xf32> to vector<2x128xf32>
    %23 = arith.mulf %18, %22 : vector<2x128xf32>
    %24 = arith.mulf %19, %21 : vector<2x128xf32>
    %25 = arith.subf %23, %24 : vector<2x128xf32>
    %26 = arith.mulf %19, %20 : vector<2x128xf32>
    %27 = arith.mulf %17, %22 : vector<2x128xf32>
    %28 = arith.subf %26, %27 : vector<2x128xf32>
    %29 = arith.mulf %17, %21 : vector<2x128xf32>
    %30 = arith.mulf %18, %20 : vector<2x128xf32>
    %31 = arith.subf %29, %30 : vector<2x128xf32>
    %32 = vector.extract_strided_slice %25 {offsets = [0, 0], sizes = [1, 128], strides = [1, 1]} : vector<2x128xf32> to vector<1x128xf32>
    %33 = vector.extract_strided_slice %25 {offsets = [0, 0], sizes = [1, 128], strides = [1, 1]} : vector<2x128xf32> to vector<1x128xf32>
    %34 = arith.mulf %32, %33 : vector<1x128xf32>
    %35 = vector.extract_strided_slice %28 {offsets = [0, 0], sizes = [1, 128], strides = [1, 1]} : vector<2x128xf32> to vector<1x128xf32>
    %36 = vector.extract_strided_slice %28 {offsets = [0, 0], sizes = [1, 128], strides = [1, 1]} : vector<2x128xf32> to vector<1x128xf32>
    %37 = arith.mulf %35, %36 : vector<1x128xf32>
    %38 = arith.addf %34, %37 : vector<1x128xf32>
    %39 = vector.extract_strided_slice %31 {offsets = [0, 0], sizes = [1, 128], strides = [1, 1]} : vector<2x128xf32> to vector<1x128xf32>
    %40 = vector.extract_strided_slice %31 {offsets = [0, 0], sizes = [1, 128], strides = [1, 1]} : vector<2x128xf32> to vector<1x128xf32>
    %41 = arith.mulf %39, %40 : vector<1x128xf32>
    %42 = arith.addf %38, %41 : vector<1x128xf32>
    %43 = math.sqrt %42 : vector<1x128xf32>
    %cst = arith.constant 5.000000e-01 : f32
    %44 = vector.broadcast %cst : f32 to vector<1x128xf32>
    %45 = arith.mulf %43, %44 : vector<1x128xf32>
    %c1 = arith.constant 1 : index
    %c0_8 = arith.constant 0 : index
    %46 = vector.load %arg2[%c1, %c0_8] : memref<3x128xf32, #tpu.memory_space<vmem>>, vector<1x128xf32>
    tpu.vector_store %arg2[%c1, %c0_8], %45 {strides = array<i32>} : memref<3x128xf32, #tpu.memory_space<vmem>>, vector<1x128xf32>,
    %47 = vector.extract_strided_slice %25 {offsets = [1, 0], sizes = [1, 128], strides = [1, 1]} : vector<2x128xf32> to vector<1x128xf32>
    %48 = vector.extract_strided_slice %2 {offsets = [5, 0], sizes = [1, 128], strides = [1, 1]} : vector<6x128xf32> to vector<1x128xf32>
    %49 = arith.mulf %47, %48 : vector<1x128xf32>
    %50 = vector.extract_strided_slice %28 {offsets = [1, 0], sizes = [1, 128], strides = [1, 1]} : vector<2x128xf32> to vector<1x128xf32>
    %51 = vector.extract_strided_slice %5 {offsets = [5, 0], sizes = [1, 128], strides = [1, 1]} : vector<6x128xf32> to vector<1x128xf32>
    %52 = arith.mulf %50, %51 : vector<1x128xf32>
    %53 = arith.addf %49, %52 : vector<1x128xf32>
    %54 = vector.extract_strided_slice %31 {offsets = [1, 0], sizes = [1, 128], strides = [1, 1]} : vector<2x128xf32> to vector<1x128xf32>
    %55 = vector.extract_strided_slice %8 {offsets = [5, 0], sizes = [1, 128], strides = [1, 1]} : vector<6x128xf32> to vector<1x128xf32>
    %56 = arith.mulf %54, %55 : vector<1x128xf32>
    %57 = arith.addf %53, %56 : vector<1x128xf32>
    %58 = math.absf %57 : vector<1x128xf32>
    %cst_9 = arith.constant 0.166666672 : f32
    %59 = vector.broadcast %cst_9 : f32 to vector<1x128xf32>
    %60 = arith.mulf %58, %59 : vector<1x128xf32>
    %c2 = arith.constant 2 : index
    %c0_10 = arith.constant 0 : index
    %61 = vector.load %arg2[%c2, %c0_10] : memref<3x128xf32, #tpu.memory_space<vmem>>, vector<1x128xf32>
    tpu.vector_store %arg2[%c2, %c0_10], %60 {strides = array<i32>} : memref<3x128xf32, #tpu.memory_space<vmem>>, vector<1x128xf32>,
    return
  }
  func.func @transform_0(%arg0: i32) -> (i32, i32) {
    %c0_i32 = arith.constant 0 : i32
    %c0_i32_0 = arith.constant 0 : i32
    return %c0_i32, %arg0 : i32, i32
  }
  func.func @transform_1(%arg0: i32) -> (i32, i32) {
    %c0_i32 = arith.constant 0 : i32
    %c0_i32_0 = arith.constant 0 : i32
    return %c0_i32, %arg0 : i32, i32
  }
}

</mosaic_0001>

<bundles_post_ra>
// kernel: _device_z.1
= control target key start
LH: loop header
LB: loop body
LE: loop exit
PB: predicated region body
PF: predicated region fallthrough
CT: control target
= control target key end

     0   :  { %s121_s0 = inlined_call_operand.vmem [shape: f32[36,128], index: 0, kind: input, shape index: {}]   ;;  %s122_s1 = inlined_call_operand.vmem [shape: f32[3,128], index: 1, kind: output, shape index: {}]  }
   0x1   :  { %v8_v0 = vld [vmem:[%s121_s0] sm:$0x3f]  ;;  %v9_v1 = vld [vmem:[%s121_s0 + $0x6] sm:$0x3f]  ;;  %v11_v2 = vld [vmem:[%s121_s0 + $0xc] sm:$0x3f] }
   0x2   :  { %v10_v3 = vsub.f32 %v8_v0, %v9_v1  ;;  %v12_v4 = vld [vmem:[%s121_s0 + $0x12] sm:$0x3f]  ;;  %v14_v5 = vld [vmem:[%s121_s0 + $0x18] sm:$0x3f]  ;;  %v15_v6 = vld [vmem:[%s121_s0 + $0x1e] sm:$0x3f] }
   0x3   :  { %v13_v7 = vsub.f32 %v11_v2, %v12_v4  ;;  %v16_v8 = vsub.f32 %v14_v5, %v15_v6 }
   0x4   :  { %v17_v9 = vmul.f32 %v10_v3, %v10_v3  ;;  %v40_v10 = vrot.slane %v10_v3, 2  ;;  %v62_v22 = vrot.slane %v10_v3, 4 }
   0x5   :  { %v18_v11 = vmul.f32 %v13_v7, %v13_v7  ;;  %v20_v12 = vmul.f32 %v16_v8, %v16_v8  ;;  %v31_v13 = vrot.slane %v16_v8, 2  ;;  %v35_v14 = vrot.slane %v13_v7, 2 }
   0x6   :  { %v42_v15 = vmul.f32 %v40_v10, %v16_v8  ;;  %v46_v16 = vmul.f32 %v40_v10, %v13_v7  ;;  %v65_v23 = vrot.slane %v13_v7, 4  ;;  %v69_v27 = vrot.slane %v16_v8, 4 }
   0x7   :  { %v19_v17 = vadd.f32 %v18_v11, %v17_v9  ;;  %v33_v18 = vmul.f32 %v31_v13, %v13_v7  ;;  %v37_v19 = vmul.f32 %v35_v14, %v16_v8  ;;  %v43_v20 = vmul.f32 %v31_v13, %v10_v3 }
   0x8   :  { %v45_v21 = vmul.f32 %v35_v14, %v10_v3 }
   0x9   :  { %v21_v24 = vadd.f32 %v20_v12, %v19_v17  ;;  %v38_v25 = vsub.f32 %v33_v18, %v37_v19  ;;  %v44_v26 = vsub.f32 %v42_v15, %v43_v20 }
   0xa   :  { %v47_v28 = vsub.f32 %v45_v21, %v46_v16 }
   0xb   :  { %80 = vrsqrt.f32 %v21_v24  ;;  %v48_v29 = vmul.f32 %v38_v25, %v38_v25  ;;  %v49_v30 = vmul.f32 %v44_v26, %v44_v26  ;;  %v64_v32 = vmul.f32 %v62_v22, %v38_v25 }
   0xc   :  { %v51_v31 = vmul.f32 %v47_v28, %v47_v28  ;;  %v67_v33 = vmul.f32 %v65_v23, %v44_v26  ;;  %v71_v34 = vmul.f32 %v69_v27, %v47_v28  ;;  %vm24_vm0 = vcmp.eq.f32.partialorder %v21_v24, inf }
   0xd   :  { %v50_v35 = vadd.f32 %v49_v30, %v48_v29  ;;  %v27_v41 = vand.u32 2147483648, %v21_v24  ;;  %vm26_vm1 = vcmp.eq.f32.partialorder %v21_v24, 0.0 }
   0xe   :  { %v68_v36 = vadd.f32 %v67_v33, %v64_v32 }
   0xf   :  { %v52_v37 = vadd.f32 %v51_v31, %v50_v35 }
  0x10   :  { %v72_v38 = vadd.f32 %v71_v34, %v68_v36 }
  0x11   :  { %82 = vrsqrt.f32 %v52_v37  ;;  %vm55_vm2 = vcmp.eq.f32.partialorder %v52_v37, inf  ;;  %v58_v47 = vand.u32 2147483648, %v52_v37  ;;  %vm57_vm3 = vcmp.eq.f32.partialorder %v52_v37, 0.0 }
  0x12   :  { %v73_v39 = vand.u32 2147483647, %v72_v38 }
  0x14   :  { %v74_v42 = vmul.f32 0.16666667, %v73_v39 }
  0x15   :  { %v81_v40 = vpop.eup %80 }
  0x16   :  { %v23_v43 = vmul.f32 %v81_v40, %v21_v24  ;;  %75 = vst [vmem:[%s122_s1 + $0x1] sm:$0x2] %v74_v42 }
  0x18   :  { %v25_v44 = vsel %vm24_vm0, %v21_v24, %v23_v43 }
  0x19   :  { %v28_v45 = vsel %vm26_vm1, %v27_v41, %v25_v44 }
  0x1a   :  { %29 = vst [vmem:[%s122_s1 - $0x4] sm:$0x10] %v28_v45 }
  0x1b   :  { %v83_v46 = vpop.eup %82 }
  0x1c   :  { %v54_v48 = vmul.f32 %v83_v46, %v52_v37 }
  0x1e   :  { %v56_v49 = vsel %vm55_vm2, %v52_v37, %v54_v48 }
  0x1f   :  { %v59_v50 = vsel %vm57_vm3, %v58_v47, %v56_v49 }
  0x20   :  { %v60_v51 = vmul.f32 0.5, %v59_v50 }
  0x22   :  { %61 = vst [vmem:[%s122_s1 + $0x1] sm:$0x1] %v60_v51 }

</bundles_post_ra>
